<compile_context>
chip_gen: v6e
topology: v6e:2x2x1
jax: 0.10.0
libtpu: 0.0.40
codegen_flags: <defaults>
</compile_context>

<pallas_src>
import jax
import jax.numpy as jnp
from jax import lax
from jax.experimental import pallas as pl
from jax.experimental.pallas import tpu as pltpu


_NT_DIMS = (((1,), (1,)), ((), ()))   # contract last dim of both (rhs-transposed matmul)


def _attn_tile(x_ref, wq_ref, wk_ref, wv_ref, bq_ref, bk_ref, bv_ref,
               gamma_ref, out_ref, attn_ref):
    """One (batch b, query-tile qi) block.

    x_ref:     (1, C, N)  full spatial extent for batch b (stays resident across qi)
    w*_ref:    (C, C)     1x1 conv weights, (C_out, C_in)
    b*_ref:    (C, 1)     conv biases (broadcast along lanes)
    gamma_ref: (1,)       scalar in SMEM
    out_ref:   (1, C, TQ) output tile, channels-first, lane-dense in TQ
    attn_ref:  (1, TQ, N) attention rows for this query tile (or None)
    """
    tq = out_ref.shape[2]
    qi = pl.program_id(1)
    start = pl.multiple_of(qi * tq, tq)

    x = x_ref[0]                                    # (C, N)
    x_q = x_ref[0, :, pl.ds(start, tq)]             # (C, TQ) query columns

    # 1x1 convs == channel matmuls (all lane-dense in the spatial axis).
    k = jnp.dot(wk_ref[...], x, preferred_element_type=jnp.float32) + bk_ref[...]     # (C, N)
    v = jnp.dot(wv_ref[...], x, preferred_element_type=jnp.float32) + bv_ref[...]     # (C, N)
    q = jnp.dot(wq_ref[...], x_q, preferred_element_type=jnp.float32) + bq_ref[...]   # (C, TQ)

    # energy[m, n] = sum_c q[c, m] * k[c, n].  Only the tiny (C, TQ) query tile
    # is transposed (XLU); k stays untransposed and is consumed by the MXU.
    energy = jnp.dot(q.T, k, preferred_element_type=jnp.float32)                      # (TQ, N)

    # Exact row softmax over the full key extent.
    m = jnp.max(energy, axis=-1, keepdims=True)
    p = jnp.exp(energy - m)
    attn = p * pl.reciprocal(jnp.sum(p, axis=-1, keepdims=True), approx=True)         # (TQ, N)

    # out[c, m] = sum_n v[c, n] * attn[m, n]  ==  v @ attn^T  (NT dot_general).
    out = lax.dot_general(v, attn, _NT_DIMS, preferred_element_type=jnp.float32)      # (C, TQ)

    out_ref[0] = gamma_ref[0] * out + x_q
    if attn_ref is not None:
        attn_ref[0] = attn


def _attn_tile_no_attn(x_ref, wq_ref, wk_ref, wv_ref, bq_ref, bk_ref, bv_ref,
                       gamma_ref, out_ref):
    _attn_tile(x_ref, wq_ref, wk_ref, wv_ref, bq_ref, bk_ref, bv_ref,
               gamma_ref, out_ref, None)


def _pick_tq(n):
    """Largest query tile in {512, 256, 128} that divides N and leaves >= 2 tiles.

    512 keeps the double-buffered (TQ, N) f32 attention tile within the default
    32 MiB scoped-VMEM limit (and well inside v7x's 64 MiB physical VMEM) up to
    N ~= 4096; smaller N falls back to a single full tile.
    """
    for tq in (512, 256, 128):
        if n % tq == 0 and n // tq >= 2:
            return tq
    return n


def self_attn_forward(x_nchw, wq, bq, wk, bk, wv, bv, gamma,
                      *, tq=None, return_attention=True):
    """x_nchw: (B, C, W, H) f32; wq/wk/wv: (C, C, 1, 1); b*: (C,); gamma: (1,)."""
    B, C, W, H = x_nchw.shape
    N = W * H
    if tq is None:
        tq = _pick_tq(N)
    assert N % tq == 0, (N, tq)
    n_q_tiles = N // tq

    # Native channels-first layout (exactly torch's .view): no transposes, the
    # spatial axis stays on lanes inside the kernel.
    x_flat = x_nchw.reshape(B, C, N).astype(jnp.float32)
    wq_m = wq.reshape(C, C).astype(jnp.float32)      # (C_out, C_in)
    wk_m = wk.reshape(C, C).astype(jnp.float32)
    wv_m = wv.reshape(C, C).astype(jnp.float32)
    bq_r = bq.reshape(C, 1).astype(jnp.float32)
    bk_r = bk.reshape(C, 1).astype(jnp.float32)
    bv_r = bv.reshape(C, 1).astype(jnp.float32)
    gamma_r = gamma.reshape(1).astype(jnp.float32)

    rep = lambda b, qi: (0, 0)                       # weights / biases: single block
    in_specs = [
        pl.BlockSpec((1, C, N), lambda b, qi: (b, 0, 0)),      # x (per-batch, resident)
        pl.BlockSpec((C, C), rep),                              # Wq
        pl.BlockSpec((C, C), rep),                              # Wk
        pl.BlockSpec((C, C), rep),                              # Wv
        pl.BlockSpec((C, 1), rep),                              # bq
        pl.BlockSpec((C, 1), rep),                              # bk
        pl.BlockSpec((C, 1), rep),                              # bv
        pl.BlockSpec(memory_space=pltpu.MemorySpace.SMEM),      # gamma (scalar)
    ]
    out_spec_o = pl.BlockSpec((1, C, tq), lambda b, qi: (b, 0, qi))
    out_spec_a = pl.BlockSpec((1, tq, N), lambda b, qi: (b, qi, 0))

    if return_attention:
        kernel = _attn_tile
        out_shape = (jax.ShapeDtypeStruct((B, C, N), jnp.float32),
                     jax.ShapeDtypeStruct((B, N, N), jnp.float32))
        out_specs = [out_spec_o, out_spec_a]
    else:
        kernel = _attn_tile_no_attn
        out_shape = jax.ShapeDtypeStruct((B, C, N), jnp.float32)
        out_specs = out_spec_o

    result = pl.pallas_call(
        kernel,
        out_shape=out_shape,
        grid_spec=pltpu.PrefetchScalarGridSpec(
            num_scalar_prefetch=0,
            grid=(B, n_q_tiles),
            in_specs=in_specs,
            out_specs=out_specs,
        ),
        compiler_params=pltpu.CompilerParams(
            dimension_semantics=("parallel", "parallel"),
        ),
    )(x_flat, wq_m, wk_m, wv_m, bq_r, bk_r, bv_r, gamma_r)

    if return_attention:
        out_flat, attn = result
    else:
        out_flat, attn = result, None

    out_nchw = out_flat.reshape(B, C, W, H)
    return out_nchw, attn, gamma


def _reference(x_nchw, wq, bq, wk, bk, wv, bv, gamma):
    """Pure-JAX reference mirroring the PyTorch forward exactly."""
    B, C, W, H = x_nchw.shape
    N = W * H
    x_flat = x_nchw.reshape(B, C, N)                                  # (B, C, N)
    wq_m, wk_m, wv_m = wq.reshape(C, C), wk.reshape(C, C), wv.reshape(C, C)
    q = jnp.einsum("oc,bcn->bon", wq_m, x_flat) + bq[None, :, None]   # (B, C, N)
    k = jnp.einsum("oc,bcn->bon", wk_m, x_flat) + bk[None, :, None]
    v = jnp.einsum("oc,bcn->bon", wv_m, x_flat) + bv[None, :, None]
    energy = jnp.einsum("bcn,bcm->bnm", q, k)                         # (B, N, N)
    attention = jax.nn.softmax(energy, axis=-1)
    out = jnp.einsum("bcn,bmn->bcm", v, attention)                    # bmm(V, A^T)
    out = out.reshape(B, C, W, H)
    out = gamma[0] * out + x_nchw
    return out, attention, gamma


if __name__ == "__main__":
    key = jax.random.PRNGKey(0)
    B, C, W, H = 2, 4, 16, 16
    N = W * H

    k_x, k_wq, k_bq, k_wk, k_bk, k_wv, k_bv = jax.random.split(key, 7)
    x = jax.random.normal(k_x, (B, C, W, H), dtype=jnp.float32)

    # Deterministic init mimicking nn.Conv2d default (uniform in +-1/sqrt(fan_in)).
    bound = 1.0 / (C ** 0.5)
    wq = jax.random.uniform(k_wq, (C, C, 1, 1), jnp.float32, -bound, bound)
    bq = jax.random.uniform(k_bq, (C,), jnp.float32, -bound, bound)
    wk = jax.random.uniform(k_wk, (C, C, 1, 1), jnp.float32, -bound, bound)
    bk = jax.random.uniform(k_bk, (C,), jnp.float32, -bound, bound)
    wv = jax.random.uniform(k_wv, (C, C, 1, 1), jnp.float32, -bound, bound)
    bv = jax.random.uniform(k_bv, (C,), jnp.float32, -bound, bound)
    # torch initializes gamma to zeros(1); use a nonzero value here so the
    # attention path actually contributes to `out` in the correctness check.
    gamma = jnp.full((1,), 0.5, dtype=jnp.float32)

    out, attn, g = self_attn_forward(x, wq, bq, wk, bk, wv, bv, gamma)
    jax.block_until_ready((out, attn, g))

    out_ref, attn_ref, _ = _reference(x, wq, bq, wk, bk, wv, bv, gamma)
    assert out.shape == (B, C, W, H)
    assert attn.shape == (B, N, N)
    # Tolerance loose enough for the approximate EUP reciprocal in the softmax.
    assert jnp.allclose(attn, attn_ref, atol=1e-3, rtol=1e-3), float(
        jnp.max(jnp.abs(attn - attn_ref)))
    assert jnp.allclose(out, out_ref, atol=1e-3, rtol=1e-3), float(
        jnp.max(jnp.abs(out - out_ref)))

    # Attention-free variant: skips the B*N*N HBM writeback entirely.
    out2, attn2, _ = self_attn_forward(x, wq, bq, wk, bk, wv, bv, gamma,
                                       return_attention=False)
    jax.block_until_ready(out2)
    assert attn2 is None
    assert jnp.allclose(out2, out_ref, atol=1e-3, rtol=1e-3)

    print("KERNEL_OK")
</pallas_src>

<mosaic_0001>
module attributes {stable_mosaic.version = 11 : i64} {
  func.func @_attn_tile(%arg0: i32, %arg1: i32, %arg2: memref<1x4x256xf32, #tpu.memory_space<vmem>>, %arg3: memref<4x4xf32, #tpu.memory_space<vmem>>, %arg4: memref<4x4xf32, #tpu.memory_space<vmem>>, %arg5: memref<4x4xf32, #tpu.memory_space<vmem>>, %arg6: memref<4x1xf32, #tpu.memory_space<vmem>>, %arg7: memref<4x1xf32, #tpu.memory_space<vmem>>, %arg8: memref<4x1xf32, #tpu.memory_space<vmem>>, %arg9: memref<1xf32, #tpu.memory_space<smem>>, %arg10: memref<1x4x128xf32, #tpu.memory_space<vmem>>, %arg11: memref<1x128x256xf32, #tpu.memory_space<vmem>>) attributes {dimension_semantics = [#tpu.dimension_semantics<parallel>, #tpu.dimension_semantics<parallel>], iteration_bounds = array<i64: 2, 2>, scalar_prefetch = 0 : i64, scratch_operands = 0 : i64, tpu.core_type = #tpu.core_type<tc>, window_params = [{transform_indices = @transform_0, window_bounds = array<i64: 1, 4, 256>}, {pipeline_mode = #tpu.pipeline_mode<synchronous>, transform_indices = @transform_1, window_bounds = array<i64: 4, 4>}, {pipeline_mode = #tpu.pipeline_mode<synchronous>, transform_indices = @transform_2, window_bounds = array<i64: 4, 4>}, {pipeline_mode = #tpu.pipeline_mode<synchronous>, transform_indices = @transform_3, window_bounds = array<i64: 4, 4>}, {pipeline_mode = #tpu.pipeline_mode<synchronous>, transform_indices = @transform_4, window_bounds = array<i64: 4, 1>}, {pipeline_mode = #tpu.pipeline_mode<synchronous>, transform_indices = @transform_5, window_bounds = array<i64: 4, 1>}, {pipeline_mode = #tpu.pipeline_mode<synchronous>, transform_indices = @transform_6, window_bounds = array<i64: 4, 1>}, {transform_indices = @transform_7, window_bounds = array<i64: 1>}, {transform_indices = @transform_8, window_bounds = array<i64: 1, 4, 128>}, {transform_indices = @transform_9, window_bounds = array<i64: 1, 128, 256>}]} {
    %c128_i32 = arith.constant 128 : i32
    %0 = arith.muli %arg1, %c128_i32 : i32
    %1 = tpu.assume_multiple %0, 128 : i32
    %c0 = arith.constant 0 : index
    %c0_0 = arith.constant 0 : index
    %c0_1 = arith.constant 0 : index
    %2 = vector.load %arg2[%c0, %c0_0, %c0_1] : memref<1x4x256xf32, #tpu.memory_space<vmem>>, vector<1x4x256xf32>
    %3 = vector.shape_cast %2 : vector<1x4x256xf32> to vector<4x256xf32>
    %c0_2 = arith.constant 0 : index
    %c0_3 = arith.constant 0 : index
    %4 = arith.index_cast %1 : i32 to index
    %5 = vector.load %arg2[%c0_2, %c0_3, %4] : memref<1x4x256xf32, #tpu.memory_space<vmem>>, vector<1x4x128xf32>
    %6 = vector.shape_cast %5 : vector<1x4x128xf32> to vector<4x128xf32>
    %c0_4 = arith.constant 0 : index
    %c0_5 = arith.constant 0 : index
    %7 = vector.load %arg4[%c0_4, %c0_5] : memref<4x4xf32, #tpu.memory_space<vmem>>, vector<4x4xf32>
    %cst = arith.constant dense<0.000000e+00> : vector<4x256xf32>
    %8 = tpu.matmul %7, %3, %cst {dimension_numbers = #tpu.dot_dimension_numbers<[1], [0], [0], [1], [0, 0, 1, 1], [], []>} : vector<4x4xf32>, vector<4x256xf32>, vector<4x256xf32> -> vector<4x256xf32>
    %c0_6 = arith.constant 0 : index
    %c0_7 = arith.constant 0 : index
    %9 = vector.load %arg7[%c0_6, %c0_7] : memref<4x1xf32, #tpu.memory_space<vmem>>, vector<4x1xf32>
    %10 = vector.broadcast %9 : vector<4x1xf32> to vector<4x256xf32>
    %11 = arith.addf %8, %10 : vector<4x256xf32>
    %c0_8 = arith.constant 0 : index
    %c0_9 = arith.constant 0 : index
    %12 = vector.load %arg5[%c0_8, %c0_9] : memref<4x4xf32, #tpu.memory_space<vmem>>, vector<4x4xf32>
    %cst_10 = arith.constant dense<0.000000e+00> : vector<4x256xf32>
    %13 = tpu.matmul %12, %3, %cst_10 {dimension_numbers = #tpu.dot_dimension_numbers<[1], [0], [0], [1], [0, 0, 1, 1], [], []>} : vector<4x4xf32>, vector<4x256xf32>, vector<4x256xf32> -> vector<4x256xf32>
    %c0_11 = arith.constant 0 : index
    %c0_12 = arith.constant 0 : index
    %14 = vector.load %arg8[%c0_11, %c0_12] : memref<4x1xf32, #tpu.memory_space<vmem>>, vector<4x1xf32>
    %15 = vector.broadcast %14 : vector<4x1xf32> to vector<4x256xf32>
    %16 = arith.addf %13, %15 : vector<4x256xf32>
    %c0_13 = arith.constant 0 : index
    %c0_14 = arith.constant 0 : index
    %17 = vector.load %arg3[%c0_13, %c0_14] : memref<4x4xf32, #tpu.memory_space<vmem>>, vector<4x4xf32>
    %cst_15 = arith.constant dense<0.000000e+00> : vector<4x128xf32>
    %18 = tpu.matmul %17, %6, %cst_15 {dimension_numbers = #tpu.dot_dimension_numbers<[1], [0], [0], [1], [0, 0, 1, 1], [], []>} : vector<4x4xf32>, vector<4x128xf32>, vector<4x128xf32> -> vector<4x128xf32>
    %c0_16 = arith.constant 0 : index
    %c0_17 = arith.constant 0 : index
    %19 = vector.load %arg6[%c0_16, %c0_17] : memref<4x1xf32, #tpu.memory_space<vmem>>, vector<4x1xf32>
    %20 = vector.broadcast %19 : vector<4x1xf32> to vector<4x128xf32>
    %21 = arith.addf %18, %20 : vector<4x128xf32>
    %22 = tpu.transpose %21, [1, 0] : vector<4x128xf32> -> vector<128x4xf32>
    %cst_18 = arith.constant dense<0.000000e+00> : vector<128x256xf32>
    %23 = tpu.matmul %22, %11, %cst_18 {dimension_numbers = #tpu.dot_dimension_numbers<[1], [0], [0], [1], [0, 0, 1, 1], [], []>} : vector<128x4xf32>, vector<4x256xf32>, vector<128x256xf32> -> vector<128x256xf32>
    %cst_19 = arith.constant dense<0xFF800000> : vector<128xf32>
    %24 = vector.multi_reduction <maximumf>, %23, %cst_19 [1] : vector<128x256xf32> to vector<128xf32>
    %25 = vector.shape_cast %24 : vector<128xf32> to vector<128x1xf32>
    %26 = vector.broadcast %25 : vector<128x1xf32> to vector<128x256xf32>
    %27 = arith.subf %23, %26 : vector<128x256xf32>
    %28 = math.exp %27 : vector<128x256xf32>
    %cst_20 = arith.constant dense<0.000000e+00> : vector<128xf32>
    %29 = vector.multi_reduction <add>, %28, %cst_20 [1] : vector<128x256xf32> to vector<128xf32>
    %30 = vector.shape_cast %29 : vector<128xf32> to vector<128x1xf32>
    %31 = tpu.reciprocal %30 {approx = true} : vector<128x1xf32> -> vector<128x1xf32>
    %32 = vector.broadcast %31 : vector<128x1xf32> to vector<128x256xf32>
    %33 = arith.mulf %28, %32 : vector<128x256xf32>
    %cst_21 = arith.constant dense<0.000000e+00> : vector<4x128xf32>
    %34 = tpu.matmul %16, %33, %cst_21 {dimension_numbers = #tpu.dot_dimension_numbers<[1], [1], [0], [0], [0, 0, 1, 0], [], []>} : vector<4x256xf32>, vector<128x256xf32>, vector<4x128xf32> -> vector<4x128xf32>
    %c0_22 = arith.constant 0 : index
    %35 = memref.load %arg9[%c0_22] : memref<1xf32, #tpu.memory_space<smem>>
    %36 = vector.broadcast %35 : f32 to vector<4x128xf32>
    %37 = arith.mulf %36, %34 : vector<4x128xf32>
    %38 = arith.addf %37, %6 : vector<4x128xf32>
    %c0_23 = arith.constant 0 : index
    %c0_24 = arith.constant 0 : index
    %c0_25 = arith.constant 0 : index
    %39 = vector.load %arg10[%c0_23, %c0_24, %c0_25] : memref<1x4x128xf32, #tpu.memory_space<vmem>>, vector<1x4x128xf32>
    %40 = vector.shape_cast %39 : vector<1x4x128xf32> to vector<4x128xf32>
    %41 = vector.shape_cast %38 : vector<4x128xf32> to vector<1x4x128xf32>
    tpu.vector_store %arg10[%c0_23, %c0_24, %c0_25], %41 {strides = array<i32>} : memref<1x4x128xf32, #tpu.memory_space<vmem>>, vector<1x4x128xf32>,
    %c0_26 = arith.constant 0 : index
    %c0_27 = arith.constant 0 : index
    %c0_28 = arith.constant 0 : index
    %42 = vector.load %arg11[%c0_26, %c0_27, %c0_28] : memref<1x128x256xf32, #tpu.memory_space<vmem>>, vector<1x128x256xf32>
    %43 = vector.shape_cast %42 : vector<1x128x256xf32> to vector<128x256xf32>
    %44 = vector.shape_cast %33 : vector<128x256xf32> to vector<1x128x256xf32>
    tpu.vector_store %arg11[%c0_26, %c0_27, %c0_28], %44 {strides = array<i32>} : memref<1x128x256xf32, #tpu.memory_space<vmem>>, vector<1x128x256xf32>,
    return
  }
  func.func @transform_0(%arg0: i32, %arg1: i32) -> (i32, i32, i32) {
    %c0_i32 = arith.constant 0 : i32
    %c0_i32_0 = arith.constant 0 : i32
    %c0_i32_1 = arith.constant 0 : i32
    return %arg0, %c0_i32, %c0_i32_0 : i32, i32, i32
  }
  func.func @transform_1(%arg0: i32, %arg1: i32) -> (i32, i32) {
    %c0_i32 = arith.constant 0 : i32
    %c0_i32_0 = arith.constant 0 : i32
    %c0_i32_1 = arith.constant 0 : i32
    return %c0_i32, %c0_i32_0 : i32, i32
  }
  func.func @transform_2(%arg0: i32, %arg1: i32) -> (i32, i32) {
    %c0_i32 = arith.constant 0 : i32
    %c0_i32_0 = arith.constant 0 : i32
    %c0_i32_1 = arith.constant 0 : i32
    return %c0_i32, %c0_i32_0 : i32, i32
  }
  func.func @transform_3(%arg0: i32, %arg1: i32) -> (i32, i32) {
    %c0_i32 = arith.constant 0 : i32
    %c0_i32_0 = arith.constant 0 : i32
    %c0_i32_1 = arith.constant 0 : i32
    return %c0_i32, %c0_i32_0 : i32, i32
  }
  func.func @transform_4(%arg0: i32, %arg1: i32) -> (i32, i32) {
    %c0_i32 = arith.constant 0 : i32
    %c0_i32_0 = arith.constant 0 : i32
    %c0_i32_1 = arith.constant 0 : i32
    return %c0_i32, %c0_i32_0 : i32, i32
  }
  func.func @transform_5(%arg0: i32, %arg1: i32) -> (i32, i32) {
    %c0_i32 = arith.constant 0 : i32
    %c0_i32_0 = arith.constant 0 : i32
    %c0_i32_1 = arith.constant 0 : i32
    return %c0_i32, %c0_i32_0 : i32, i32
  }
  func.func @transform_6(%arg0: i32, %arg1: i32) -> (i32, i32) {
    %c0_i32 = arith.constant 0 : i32
    %c0_i32_0 = arith.constant 0 : i32
    %c0_i32_1 = arith.constant 0 : i32
    return %c0_i32, %c0_i32_0 : i32, i32
  }
  func.func @transform_7(%arg0: i32, %arg1: i32) -> i32 {
    %c0_i32 = arith.constant 0 : i32
    %c0_i32_0 = arith.constant 0 : i32
    return %c0_i32 : i32
  }
  func.func @transform_8(%arg0: i32, %arg1: i32) -> (i32, i32, i32) {
    %c0_i32 = arith.constant 0 : i32
    %c0_i32_0 = arith.constant 0 : i32
    return %arg0, %c0_i32, %arg1 : i32, i32, i32
  }
  func.func @transform_9(%arg0: i32, %arg1: i32) -> (i32, i32, i32) {
    %c0_i32 = arith.constant 0 : i32
    %c0_i32_0 = arith.constant 0 : i32
    return %arg0, %arg1, %c0_i32 : i32, i32, i32
  }
}

</mosaic_0001>

<bundles_post_ra>
// kernel: tpu_custom_call.1
= control target key start
LH: loop header
LB: loop body
LE: loop exit
PB: predicated region body
PF: predicated region fallthrough
CT: control target
= control target key end

     0   :  { %s2452_s0 = inlined_call_operand.vmem [shape: f32[2,4,256], index: 0, kind: input, shape index: {}]   ;;  %s2453_s1 = inlined_call_operand.hbm [shape: f32[4,4], index: 1, kind: input, shape index: {}]   ;;  %s2454_s2 = inlined_call_operand.vmem [shape: f32[4,4], index: 2, kind: input, shape index: {}]   ;;  %s2455_s3 = inlined_call_operand.hbm [shape: f32[4,4], index: 3, kind: input, shape index: {}]   ;;  %s2456_s4 = inlined_call_operand.vmem [shape: f32[4,1], index: 4, kind: input, shape index: {}]   ;;  %s2457_s5 = inlined_call_operand.vmem [shape: f32[4,1], index: 5, kind: input, shape index: {}]   ;;  %s2458_s6 = inlined_call_operand.vmem [shape: f32[4,1], index: 6, kind: input, shape index: {}]   ;;  %s2459_s7 = inlined_call_operand.<no memory space> [shape: f32[1], index: 7, kind: input, shape index: {}]   ;;  %s2460_s8 = inlined_call_operand.hbm [shape: f32[2,4,256], index: 8, kind: output, shape index: {0}]   ;;  %s2461_s9 = inlined_call_operand.hbm [shape: f32[2,256,256], index: 9, kind: output, shape index: {1}]  }
   0x1   :  { %2466 = sst [smem:[#allocation16_spill]] %s2452_s0 }
   0x2   :  { %2467 = sst [smem:[#allocation17_spill]] %s2453_s1 }
   0x3   :  { %2468 = sst [smem:[#allocation18_spill]] %s2454_s2 }
   0x4   :  { %2469 = sst [smem:[#allocation19_spill]] %s2455_s3 }
   0x5   :  { %2470 = sst [smem:[#allocation20_spill]] %s2456_s4 }
   0x6   :  { %2471 = sst [smem:[#allocation21_spill]] %s2457_s5 }
   0x7   :  { %15 = sst [smem:[#allocation2]] %s2459_s7 }
   0x8   :  { %16 = vsyncpa [#allocation4], 0 }
   0x9   :  { %17 = vsyncpa [#allocation7], 0 }
   0xa   :  { %18 = vsyncpa [#allocation5], 0 }
   0xb   :  { %20 = vsyncpa [#allocation5 + $0x1], 0 }
   0xc   :  { %21 = vsyncpa [#allocation10], 0 }
   0xd   :  { %23 = vsyncpa [#allocation10 + $0x1], 0  ;;  %s1917_s11 = smov 0   ;;  %s1919_s12 = smov 0  }
   0xe   :  { %s1921_s13 = smov 0   ;;  %s1923_s14 = smov 0  }
   0xf   :  { %s1925_s15 = smov 0   ;;  %s1927_s16 = smov 0  }
  0x10   :  { %s1929_s17 = smov 0   ;;  %s1931_s7 = smov 0  }
  0x11 LB: > { %s1411_s18 = sadd.s32 4294967295, %s1853_s7   ;;  %s1412_s19 = sadd.s32 4294967294, %s1853_s7   ;;  %s1853_s7 = sphi %s1931_s7, %s29_s7   ;;  %s1849_s17 = sphi %s1929_s17, %s2494_s17   ;;  %s1845_s16 = sphi %s1927_s16, %s2493_s16   ;;  %s1841_s15 = sphi %s1925_s15, %s2492_s15   ;;  %s1837_s14 = sphi %s1923_s14, %s2491_s14   ;;  %s1833_s13 = sphi %s1921_s13, %s2490_s13   ;;  %s1829_s12 = sphi %s1919_s12, %s2489_s12   ;;  %s1825_s11 = sphi %s1917_s11, %s2488_s11  }
  0x12   : > { %s38_s20 = sadd.s32 1, %s1845_s16  ;;  %s41_s21 = sadd.s32 1, %s1849_s17 }
  0x13   : > { %p39_p0 = scmp.ge.s32.totalorder %s38_s20, 2  ;;  %s223_s22 = sadd.s32 1, %s1833_s13 }
  0x14   : > { %p233_p1 = scmp.ne.s32.totalorder %s1833_s13, %s1829_s12  ;;  %p234_p2 = scmp.eq.s32.totalorder %s1411_s18, 3 }
  0x15   : > { %s2496_s20 = smov (%p39_p0, %s38_s20), 0  ;;  %s2498_s21 = smov (!%p39_p0, %s41_s21), %s1849_s17 }
  0x16   : > { %s219_s23 = ssub.s32 %s1845_s16, %s2496_s20  ;;  %p1969_p3 = por %p234_p2, %p233_p1 }
  0x17   : > { %p43_p4 = scmp.ge.s32.totalorder %s2498_s21, 2  ;;  %p239_p5 = scmp.ne.s32.totalorder %s1829_s12, %s1825_s11 }
  0x18   : > { %s2472_s24 = scalar_select %p1969_p3, 1, 0 }
  0x19   : > { %p240_p6 = scmp.eq.s32.totalorder %s1412_s19, 3  ;;  %p1413_p7 = scmp.ge.s32.totalorder %s1853_s7, 1 }
  0x1a   : > { %s2500_s21 = smov (%p43_p4, %s2498_s21), 0  ;;  %p275_p9 = scmp.lt.s32.totalorder %s1853_s7, 5 }
  0x1b   : > { %2473 = sst [smem:[#allocation15_spill]] %s2500_s21  ;;  %p1978_p8 = por %p240_p6, %p239_p5 }
  0x1c   : > { %s218_s26 = ssub.s32 %s1849_s17, %s2500_s21  ;;  %p1985_p10 = pnand %p1413_p7, %p275_p9 }
  0x1d   : > { %s2474_s25 = scalar_select %p1978_p8, 1, 0 }
  0x1e   : > { %s220_s27 = sor.u32 %s219_s23, %s218_s26  ;;  %p1989_p12 = scmp.eq.s32.totalorder %s1411_s18, 0 }
  0x1f   : > { %p221_p11 = scmp.eq.s32.totalorder %s220_s27, 0  ;;  %p1483_p13 = pneg %p1985_p10 }
  0x20   : > { %s2476_s29 = scalar_select %p1989_p12, 1, 0 }
  0x21   : > { %s1996_s30 = scalar_select %p221_p11, %s1833_s13, %s223_s22  }
  0x22   : > { %s1855_s10 = smov [#allocation3]   ;;  %p2000_p0 = pnand %p1989_p12, %p1483_p13 }
  0x23   : > { %s288_s19 = sshll.u32 %s1855_s10, 4  ;;  %s1856_s26 = smov [#allocation6]   ;;  %s289_s19 = int_to_ptr.vmem [resolvable:$true] %s288_s19 }
  0x24   : > { %s302_s18 = sshll.u32 %s1856_s26, 4  ;;  %p1673_p1 = pneg %p2000_p0  ;;  %s303_s18 = int_to_ptr.vmem [resolvable:$true] %s302_s18 }
  0x25   : > { %s1682_s27 = scalar_lea.vmem %s289_s19, 64  ;;  %p1690_p6 = scmp.lt.s32.totalorder %s289_s19, %s289_s19 }
  0x26   : > { %p1683_p2 = scmp.ne.s32.totalorder %s289_s19, %s1682_s27  ;;  %p1691_p7 = scmp.lt.s32.totalorder %s1682_s27, %s1682_s27 }
  0x28   : > { %p1685_p4 = pnand %p1683_p2, %p1673_p1  ;;  %p1692_p9 = por %p1691_p7, %p1690_p6 }
  0x2a   : > { %p1686_p5 = pneg %p1685_p4 }
  0x2c   : > { %p1693_p11 = pnand %p1692_p9, %p1686_p5 }
  0x2e   : > { %1696 = shalt.err (!%p1693_p11)
}
  0x2f   : > { %s2478_s1 = sld [smem:[#allocation17_spill]]  ;;  %s1708_s26 = scalar_lea.vmem %s303_s18, 64 }
  0x30   : > { %p1709_p13 = scmp.ne.s32.totalorder %s303_s18, %s1708_s26  ;;  %p1716_p4 = scmp.lt.s32.totalorder %s303_s18, %s303_s18 }
  0x31   : > { %p1717_p3 = scmp.lt.s32.totalorder %s1708_s26, %s1708_s26 }
  0x32   : > { %p1711_p8 = pnand %p1709_p13, %p1673_p1 }
  0x33   : > { %p1718_p12 = por %p1717_p3, %p1716_p4 }
  0x34   : > { %p1712_p2 = pneg %p1711_p8 }
  0x35   : > { %1486 = dma.hbm_to_vmem [thread:$0]  (!%p2000_p0), %s2478_s1, 64, %s289_s19, [#allocation4]  }
  0x36   : > { %p1719_p6 = pnand %p1718_p12, %p1712_p2 }
  0x38   : > { %1722 = shalt.err (!%p1719_p6)
}
  0x39   : > { %s2479_s3 = sld [smem:[#allocation19_spill]]  ;;  %p2480_p5 = scmp.ne.s32.totalorder (!%p1985_p10), %s2476_s29, 0 }
  0x3b   : > { %335 = sbr.rel (%p1985_p10) target bundleno = 1249 (0x4e1), region = 52 }
  0x3f   : > { %1489 = dma.hbm_to_vmem [thread:$0]  (!%p2000_p0), %s2479_s3, 64, %s303_s18, [#allocation7]  }
  0x40   : > { %1808 = dma.done.wait (%p2480_p5), [#allocation4], 64  }
  0x41   : > { %1810 = vsyncadd (%p2480_p5), [#allocation4], 4294967232 }
  0x42   : > { %1812 = dma.done.wait (%p2480_p5), [#allocation7], 64  }
  0x43   : > { %1814 = vsyncadd (%p2480_p5), [#allocation7], 4294967232  ;;  %p380_p3 = scmp.lt.s32.totalorder %s1841_s15, 1  ;;  %s1424_s21 = sshll.u32 %s1837_s14, 7  ;;  %v1857_v0 = vmov 0.0   ;;  %v1858_v1 = vmov 0  }
  0x44   : > { %s388_s19 = sshra.s32 %s1424_s21, 7  ;;  %475 = vmatprep.mubr.f32.mxu0 %v1857_v0  ;;  %556 = vmatprep.mubr.f32.mxu1 %v1857_v0  ;;  %s2481_s0 = sld [smem:[#allocation16_spill]]  ;;  %vm406_vm0 = vcmask 1043456   ;;  %vm402_vm1 = vcmask 31744   ;;  %vm1859_vm2 = vmmov 0  }
  0x45   : > { %s381_s28 = scalar_select %p380_p3, %s1841_s15, 1  ;;  %1573 = vset.pattern.permute.xlu0 %v1858_v1  ;;  %v563_v8 = vld [vmem:[#allocation3] sm:$0xf]  ;;  %v482_v9 = vld [vmem:[#allocation6] sm:$0xf] }
  0x46   : > { %s1425_s18 = sshll.u32 %s388_s19, 2  ;;  %s2482_s4 = sld [smem:[#allocation20_spill]] }
  0x47   : > { %s1462_s23 = sshll.u32 %s381_s28, 3  ;;  %s2483_s2 = sld [smem:[#allocation18_spill]] }
  0x48   : > { %s2484_s5 = sld [smem:[#allocation21_spill]]  ;;  %s1463_s10 = sshll.u32 %s1837_s14, 5 }
  0x49   : > { %p2485_p10 = scmp.ne.s32.totalorder %s2472_s24, 0 }
  0x4a   : > { %s384_s29 = scalar_lea.vmem %s2481_s0, %s1462_s23  ;;  %s2300_s23 = sand.u32 1, %s1829_s12  }
  0x4b   : > { %v387_v2 = vld [vmem:[%s384_s29] sm:$0xff]  ;;  %s391_s26 = scalar_lea.vmem %s384_s29, %s1425_s18  ;;  %s1421_s18 = sshll.u32 %s2300_s23, 8 }
  0x4c   : > { %v401_v3 = vcombine.high %v387_v2, %v387_v2  ;;  %v564_v4 = vld [vmem:[%s2482_s4] sm:$0xf]  ;;  %s2305_s22 = scalar_lea.vmem [#allocation9], %s1421_s18  ;;  %s1458_s29 = sshll.u32 %s1841_s15, 6 }
  0x4d   : > { %v393_v5 = vld [vmem:[%s2483_s2] sm:$0xf]  ;;  %567 = vperm.xlu0 %1573, %v564_v4   ;;  %s1277_s27 = sshll.u32 %s2305_s22, 4  ;;  %s1246_s3 = scalar_lea.sflag [#allocation10], %s2300_s23  ;;  %s2374_s27 = int_to_ptr.vmem [resolvable:$true] %s1277_s27 }
  0x4e   : > { %1426 = vmatprep.subr.msk.mxu0 %vm406_vm0, %v401_v3  ;;  %v2047_v6 = vld [vmem:[%s391_s26] sm:$0xf]  ;;  %1429 = vmatprep.subr.msk.mxu1 %vm406_vm0, %v401_v3  ;;  %s1274_s26 = sadd.s32 %s1463_s10, %s1458_s29  ;;  %s1723_s18 = scalar_lea.vmem %s2374_s27, 4096 }
  0x4f   : > { %1427 = vmatpush1.msk.msra.mxu0 %vm406_vm0, %v387_v2  ;;  %v394_v7 = vld [vmem:[%s2484_s5] sm:$0xf]  ;;  %1430 = vmatpush1.msk.msra.mxu1 %vm406_vm0, %v387_v2  ;;  %s1459_s21 = sshll.u32 %s1274_s26, 7  ;;  %p1724_p8 = scmp.ne.s32.totalorder %s2374_s27, %s1723_s18 }
  0x50   : > { %1428 = vmatmul.mubr.msk.f32.vlgmr.msra.gmra.mxu0 %vm402_vm1, %v393_v5  ;;  %1466 = vmatprep.subr.mxu0 %v1857_v0  ;;  %s2379_s1 = scalar_lea.hbm %s2461_s9, %s1459_s21  ;;  %s1860_s0 = smov [#allocation9]  }
  0x51   : > { %1467 = vmatpush3.msk.msra.mxu0 %vm406_vm0, %v2047_v6  ;;  %1468 = vmatprep.mubr.msk.f32.mxu0 %vm1859_vm2, %v1857_v0  ;;  %p1725_p12 = pnand %p1724_p8, %p2485_p10  ;;  %s1727_s10 = sshll.u32 %s1860_s0, 4  ;;  %s1728_s10 = int_to_ptr.vmem [resolvable:$false] %s1727_s10 }
  0x52   : > { %397 = vperm.xlu0 %1573, %v394_v7   ;;  %1431 = vmatmul.mubr.msk.f32.vlgmr.msra.gmra.mxu1 %vm402_vm1, %v482_v9  ;;  %p1730_p1 = scmp.lt.s32.totalorder %s2374_s27, %s1728_s10 }
  0x53   : > { %796 = vmatprep.mubr.f32.mxu1 %v1857_v0  ;;  %p1726_p0 = pneg %p1725_p12 }
  0x54   : > { %1469 = vmatmul.mubr.msk.f32.vlgmr.msra.gmra.mxu0 %vm402_vm1, %v563_v8 }
  0xc8   : > { %v568_v10 = vpop.permute.xlu0 %567 }
  0xcd   : > { %v398_v12 = vpop.permute.xlu0 %397 }
 0x110   : > { %v477_v11 = vpop.f32.mrf.mxu0 }
 0x111   : > { %v478_v15 = vadd.f32 %v477_v11, %v398_v12 }
 0x112   : > { %v479_v13 = vpop.f32.mrf.mxu0  ;;  %v2096_v35 = vpop.f32.mrf.mxu1 }
 0x113   : > { %v480_v14 = vadd.f32 %v479_v13, %v398_v12 }
 0x114   : > { %v642_v16 = vpop.f32.mrf.mxu0  ;;  %v2098_v36 = vpop.f32.mrf.mxu1 }
 0x115   : > { %1434 = vmatprep.subr.msk.mxu1 %vm406_vm0, %v480_v14  ;;  %v643_v17 = vadd.f32 %v642_v16, %v568_v10 }
 0x116   : > { %v1470_v18 = vpop.f32.mrf.mxu0  ;;  %1435 = vmatpush1.msk.msra.mxu1 %vm406_vm0, %v478_v15 }
 0x117   : > { %646 = vxpose.xlu1.b32.start.end [1/1] (short) %v643_v17, 128 }
 0x193   : > { %v662_v19 = vpop.trf.xlu1 }
 0x194   : > { %1436 = vmatmul.mubr.msk.f32.vlgmr.msra.gmra.mxu1 %vm402_vm1, %v662_v19 }
 0x195   : > { %802 = vmatprep.mubr.f32.mxu1 %v1857_v0 }
 0x197   : > { %v663_v20 = vpop.trf.xlu1 }
 0x198   : > { %1437 = vmatmul.mubr.msk.f32.gmra.mxu1 %vm402_vm1, %v663_v20 }
 0x199   : > { %808 = vmatprep.mubr.f32.mxu1 %v1857_v0 }
 0x19b   : > { %v664_v21 = vpop.trf.xlu1 }
 0x19c   : > { %1438 = vmatmul.mubr.msk.f32.gmra.mxu1 %vm402_vm1, %v664_v21 }
 0x19d   : > { %814 = vmatprep.mubr.f32.mxu1 %v1857_v0 }
 0x19f   : > { %v665_v22 = vpop.trf.xlu1 }
 0x1a0   : > { %1439 = vmatmul.mubr.msk.f32.gmra.mxu1 %vm402_vm1, %v665_v22 }
 0x1a1   : > { %820 = vmatprep.mubr.f32.mxu1 %v1857_v0 }
 0x1a3   : > { %v666_v23 = vpop.trf.xlu1 }
 0x1a4   : > { %1440 = vmatmul.mubr.msk.f32.gmra.mxu1 %vm402_vm1, %v666_v23 }
 0x1a5   : > { %826 = vmatprep.mubr.f32.mxu1 %v1857_v0 }
 0x1a7   : > { %v667_v24 = vpop.trf.xlu1 }
 0x1a8   : > { %1441 = vmatmul.mubr.msk.f32.gmra.mxu1 %vm402_vm1, %v667_v24 }
 0x1a9   : > { %832 = vmatprep.mubr.f32.mxu1 %v1857_v0 }
 0x1ab   : > { %v668_v25 = vpop.trf.xlu1 }
 0x1ac   : > { %1442 = vmatmul.mubr.msk.f32.gmra.mxu1 %vm402_vm1, %v668_v25 }
 0x1ad   : > { %838 = vmatprep.mubr.f32.mxu1 %v1857_v0 }
 0x1af   : > { %v669_v26 = vpop.trf.xlu1 }
 0x1b0   : > { %1443 = vmatmul.mubr.msk.f32.gmra.mxu1 %vm402_vm1, %v669_v26 }
 0x1b1   : > { %844 = vmatprep.mubr.f32.mxu1 %v1857_v0 }
 0x1b3   : > { %v670_v27 = vpop.trf.xlu1 }
 0x1b4   : > { %1444 = vmatmul.mubr.msk.f32.gmra.mxu1 %vm402_vm1, %v670_v27 }
 0x1b5   : > { %850 = vmatprep.mubr.f32.mxu1 %v1857_v0 }
 0x1b7   : > { %v671_v28 = vpop.trf.xlu1 }
 0x1b8   : > { %1445 = vmatmul.mubr.msk.f32.gmra.mxu1 %vm402_vm1, %v671_v28 }
 0x1b9   : > { %856 = vmatprep.mubr.f32.mxu1 %v1857_v0 }
 0x1bb   : > { %v672_v29 = vpop.trf.xlu1 }
 0x1bc   : > { %1446 = vmatmul.mubr.msk.f32.gmra.mxu1 %vm402_vm1, %v672_v29 }
 0x1bd   : > { %862 = vmatprep.mubr.f32.mxu1 %v1857_v0 }
 0x1bf   : > { %v673_v30 = vpop.trf.xlu1 }
 0x1c0   : > { %1447 = vmatmul.mubr.msk.f32.gmra.mxu1 %vm402_vm1, %v673_v30 }
 0x1c1   : > { %868 = vmatprep.mubr.f32.mxu1 %v1857_v0 }
 0x1c3   : > { %v674_v31 = vpop.trf.xlu1 }
 0x1c4   : > { %1448 = vmatmul.mubr.msk.f32.gmra.mxu1 %vm402_vm1, %v674_v31 }
 0x1c5   : > { %874 = vmatprep.mubr.f32.mxu1 %v1857_v0 }
 0x1c7   : > { %v675_v32 = vpop.trf.xlu1 }
 0x1c8   : > { %1449 = vmatmul.mubr.msk.f32.gmra.mxu1 %vm402_vm1, %v675_v32 }
 0x1c9   : > { %880 = vmatprep.mubr.f32.mxu1 %v1857_v0 }
 0x1cb   : > { %v676_v33 = vpop.trf.xlu1 }
 0x1cc   : > { %1450 = vmatmul.mubr.msk.f32.gmra.mxu1 %vm402_vm1, %v676_v33 }
 0x1cd   : > { %886 = vmatprep.mubr.f32.mxu1 %v1857_v0 }
 0x1cf   : > { %v677_v34 = vpop.trf.xlu1 }
 0x1d0   : > { %1451 = vmatmul.mubr.msk.f32.gmra.mxu1 %vm402_vm1, %v677_v34 }
 0x254   : > { %v2100_v37 = vpop.f32.mrf.mxu1 }
 0x256   : > { %v2102_v38 = vpop.f32.mrf.mxu1 }
 0x257   : > { %v893_v21 = vmax.f32 %v2100_v37, %v2102_v38 }
 0x258   : > { %v2104_v39 = vpop.f32.mrf.mxu1 }
 0x25a   : > { %v2106_v40 = vpop.f32.mrf.mxu1 }
 0x25b   : > { %v896_v20 = vmax.f32 %v2104_v39, %v2106_v40 }
 0x25c   : > { %v2108_v41 = vpop.f32.mrf.mxu1 }
 0x25e   : > { %v2110_v42 = vpop.f32.mrf.mxu1 }
 0x25f   : > { %v899_v19 = vmax.f32 %v2108_v41, %v2110_v42 }
 0x260   : > { %v2112_v43 = vpop.f32.mrf.mxu1 }
 0x262   : > { %v2114_v44 = vpop.f32.mrf.mxu1 }
 0x263   : > { %v902_v18 = vmax.f32 %v2112_v43, %v2114_v44 }
 0x264   : > { %v2116_v45 = vpop.f32.mrf.mxu1 }
 0x266   : > { %v2118_v46 = vpop.f32.mrf.mxu1 }
 0x267   : > { %v905_v17 = vmax.f32 %v2116_v45, %v2118_v46 }
 0x268   : > { %v2120_v47 = vpop.f32.mrf.mxu1 }
 0x26a   : > { %v2122_v48 = vpop.f32.mrf.mxu1 }
 0x26b   : > { %v908_v16 = vmax.f32 %v2120_v47, %v2122_v48 }
 0x26c   : > { %v2124_v49 = vpop.f32.mrf.mxu1 }
 0x26e   : > { %v2126_v50 = vpop.f32.mrf.mxu1 }
 0x26f   : > { %v911_v15 = vmax.f32 %v2124_v49, %v2126_v50 }
 0x270   : > { %v2128_v51 = vpop.f32.mrf.mxu1 }
 0x272   : > { %v2130_v52 = vpop.f32.mrf.mxu1 }
 0x273   : > { %v914_v14 = vmax.f32 %v2128_v51, %v2130_v52 }
 0x274   : > { %v2132_v53 = vpop.f32.mrf.mxu1 }
 0x276   : > { %v2134_v54 = vpop.f32.mrf.mxu1 }
 0x277   : > { %v917_v13 = vmax.f32 %v2132_v53, %v2134_v54 }
 0x278   : > { %v2136_v55 = vpop.f32.mrf.mxu1 }
 0x27a   : > { %v2138_v56 = vpop.f32.mrf.mxu1 }
 0x27b   : > { %v920_v12 = vmax.f32 %v2136_v55, %v2138_v56 }
 0x27c   : > { %v2140_v57 = vpop.f32.mrf.mxu1 }
 0x27e   : > { %v2142_v58 = vpop.f32.mrf.mxu1 }
 0x27f   : > { %v923_v11 = vmax.f32 %v2140_v57, %v2142_v58 }
 0x280   : > { %v2144_v59 = vpop.f32.mrf.mxu1 }
 0x282   : > { %v2146_v60 = vpop.f32.mrf.mxu1 }
 0x283   : > { %v926_v10 = vmax.f32 %v2144_v59, %v2146_v60 }
 0x284   : > { %v870_v61 = vpop.f32.mrf.mxu1 }
 0x286   : > { %v872_v62 = vpop.f32.mrf.mxu1 }
 0x287   : > { %v929_v9 = vmax.f32 %v870_v61, %v872_v62 }
 0x288   : > { %v876_v63 = vpop.f32.mrf.mxu1 }
 0x28a   : > { %v2148_v0 = vpop.f32.mrf.mxu1 }
 0x28b   : > { %v932_v8 = vmax.f32 %v876_v63, %v2148_v0 }
 0x28c   : > { %v882_v1 = vpop.f32.mrf.mxu1 }
 0x28e   : > { %v884_v2 = vpop.f32.mrf.mxu1 }
 0x28f   : > { %v935_v3 = vmax.f32 %v882_v1, %v884_v2 }
 0x290   : > { %v888_v4 = vpop.f32.mrf.mxu1 }
 0x291   : > { %936 = vmax.xlane.f32.xlu0 %v935_v3 }
 0x292   : > { %v890_v5 = vpop.f32.mrf.mxu1 }
 0x293   : > { %v938_v7 = vmax.f32 %v888_v4, %v890_v5 }
 0x295   : > { %933 = vmax.xlane.f32.xlu0 %v932_v8  ;;  %939 = vmax.xlane.f32.xlu1 %v938_v7 }
 0x299   : > { %930 = vmax.xlane.f32.xlu0 %v929_v9 }
 0x29d   : > { %927 = vmax.xlane.f32.xlu0 %v926_v10 }
 0x2a1   : > { %924 = vmax.xlane.f32.xlu0 %v923_v11 }
 0x2a5   : > { %921 = vmax.xlane.f32.xlu0 %v920_v12 }
 0x2a9   : > { %918 = vmax.xlane.f32.xlu0 %v917_v13 }
 0x2ad   : > { %915 = vmax.xlane.f32.xlu0 %v914_v14 }
 0x2b1   : > { %912 = vmax.xlane.f32.xlu0 %v911_v15 }
 0x2b5   : > { %909 = vmax.xlane.f32.xlu0 %v908_v16 }
 0x2b9   : > { %906 = vmax.xlane.f32.xlu0 %v905_v17 }
 0x2bd   : > { %903 = vmax.xlane.f32.xlu0 %v902_v18 }
 0x2c1   : > { %900 = vmax.xlane.f32.xlu0 %v899_v19 }
 0x2c5   : > { %897 = vmax.xlane.f32.xlu0 %v896_v20 }
 0x2c9   : > { %894 = vmax.xlane.f32.xlu0 %v893_v21 }
 0x31a   : > { %v937_v22 = vpop.xlane.xlu0 %936 }
 0x31b   : > { %v969_v23 = vsub.f32 %v882_v1, %v937_v22  ;;  %v970_v24 = vsub.f32 %v884_v2, %v937_v22 }
 0x31d   : > { %v1029_v27 = vmul.f32 1.442695, %v969_v23  ;;  %v1031_v29 = vmul.f32 1.442695, %v970_v24 }
 0x31e   : > { %v934_v25 = vpop.xlane.xlu0 %933  ;;  %v940_v26 = vpop.xlane.xlu1 %939 }
 0x31f   : > { %v971_v28 = vsub.f32 %v888_v4, %v940_v26  ;;  %v972_v30 = vsub.f32 %v890_v5, %v940_v26  ;;  %1575 = vpow2.f32 %v1029_v27  ;;  %v967_v34 = vsub.f32 %v876_v63, %v934_v25 }
 0x320   : > { %1577 = vpow2.f32 %v1031_v29  ;;  %v968_v8 = vsub.f32 %v2148_v0, %v934_v25 }
 0x321   : > { %v1033_v31 = vmul.f32 1.442695, %v971_v28  ;;  %v1035_v32 = vmul.f32 1.442695, %v972_v30  ;;  %v1025_v10 = vmul.f32 1.442695, %v967_v34 }
 0x322   : > { %v931_v33 = vpop.xlane.xlu0 %930  ;;  %v1027_v11 = vmul.f32 1.442695, %v968_v8 }
 0x323   : > { %v965_v3 = vsub.f32 %v870_v61, %v931_v33  ;;  %v966_v7 = vsub.f32 %v872_v62, %v931_v33  ;;  %1579 = vpow2.f32 %v1033_v31 }
 0x324   : > { %1581 = vpow2.f32 %v1035_v32 }
 0x325   : > { %v1021_v9 = vmul.f32 1.442695, %v965_v3  ;;  %v1023_v1 = vmul.f32 1.442695, %v966_v7 }
 0x326   : > { %v928_v2 = vpop.xlane.xlu0 %927 }
 0x327   : > { %1583 = vpow2.f32 %v1021_v9  ;;  %v963_v4 = vsub.f32 %v2144_v59, %v928_v2  ;;  %v964_v5 = vsub.f32 %v2146_v60, %v928_v2 }
 0x328   : > { %1585 = vpow2.f32 %v1023_v1 }
 0x329   : > { %v1017_v12 = vmul.f32 1.442695, %v963_v4  ;;  %v1019_v63 = vmul.f32 1.442695, %v964_v5  ;;  %1587 = vpow2.f32 %v1025_v10 }
 0x32a   : > { %v925_v61 = vpop.xlane.xlu0 %924  ;;  %1589 = vpow2.f32 %v1027_v11 }
 0x32b   : > { %v961_v62 = vsub.f32 %v2140_v57, %v925_v61  ;;  %v962_v0 = vsub.f32 %v2142_v58, %v925_v61  ;;  %1591 = vpow2.f32 %v1017_v12 }
 0x32c   : > { %1593 = vpow2.f32 %v1019_v63  ;;  %v2182_v16 = vpop.eup %1575 }
 0x32d   : > { %v1013_v13 = vmul.f32 1.442695, %v961_v62  ;;  %v1015_v14 = vmul.f32 1.442695, %v962_v0  ;;  %v2184_v17 = vpop.eup %1577 }
 0x32e   : > { %v922_v15 = vpop.xlane.xlu0 %921  ;;  %v1079_v29 = vadd.f32 %v2184_v17, %v2182_v16 }
 0x32f   : > { %1595 = vpow2.f32 %v1013_v13  ;;  %v959_v59 = vsub.f32 %v2136_v55, %v922_v15  ;;  %v960_v60 = vsub.f32 %v2138_v56, %v922_v15 }
 0x330   : > { %1597 = vpow2.f32 %v1015_v14  ;;  %v2186_v19 = vpop.eup %1579 }
 0x331   : > { %v1009_v18 = vmul.f32 1.442695, %v959_v59  ;;  %v1011_v57 = vmul.f32 1.442695, %v960_v60  ;;  %v2188_v20 = vpop.eup %1581 }
 0x332   : > { %v919_v58 = vpop.xlane.xlu0 %918  ;;  %v1082_v56 = vadd.f32 %v2188_v20, %v2186_v19 }
 0x333   : > { %1599 = vpow2.f32 %v1009_v18  ;;  %v957_v21 = vsub.f32 %v2132_v53, %v919_v58  ;;  %v958_v22 = vsub.f32 %v2134_v54, %v919_v58 }
 0x334   : > { %v2192_v55 = vpop.eup %1583  ;;  %1601 = vpow2.f32 %v1011_v57  ;;  %1083 = vadd.xlane.f32.xlu0 %v1082_v56 }
 0x335   : > { %v2196_v23 = vpop.eup %1585  ;;  %v1005_v24 = vmul.f32 1.442695, %v957_v21  ;;  %v1007_v25 = vmul.f32 1.442695, %v958_v22 }
 0x336   : > { %v916_v26 = vpop.xlane.xlu0 %915  ;;  %v1073_v27 = vadd.f32 %v2196_v23, %v2192_v55  ;;  %v2202_v28 = vpop.eup %1587 }
 0x337   : > { %1603 = vpow2.f32 %v1005_v24  ;;  %v955_v53 = vsub.f32 %v2128_v51, %v916_v26  ;;  %v956_v54 = vsub.f32 %v2130_v52, %v916_v26  ;;  %v2206_v30 = vpop.eup %1589 }
 0x338   : > { %1605 = vpow2.f32 %v1007_v25  ;;  %1074 = vadd.xlane.f32.xlu1 %v1073_v27  ;;  %v2208_v33 = vpop.eup %1591  ;;  %1080 = vadd.xlane.f32.xlu0 %v1079_v29  ;;  %v1076_v8 = vadd.f32 %v2206_v30, %v2202_v28 }
 0x339   : > { %v1001_v31 = vmul.f32 1.442695, %v955_v53  ;;  %v1003_v32 = vmul.f32 1.442695, %v956_v54  ;;  %v2210_v3 = vpop.eup %1593 }
 0x33a   : > { %v913_v34 = vpop.xlane.xlu0 %912  ;;  %v1070_v11 = vadd.f32 %v2210_v3, %v2208_v33 }
 0x33b   : > { %1607 = vpow2.f32 %v1001_v31  ;;  %v953_v51 = vsub.f32 %v2124_v49, %v913_v34  ;;  %v954_v52 = vsub.f32 %v2126_v50, %v913_v34 }
 0x33c   : > { %v2214_v7 = vpop.eup %1595  ;;  %1609 = vpow2.f32 %v1003_v32  ;;  %1077 = vadd.xlane.f32.xlu0 %v1076_v8 }
 0x33d   : > { %v2218_v9 = vpop.eup %1597  ;;  %v997_v1 = vmul.f32 1.442695, %v953_v51  ;;  %v999_v2 = vmul.f32 1.442695, %v954_v52 }
 0x33e   : > { %v910_v10 = vpop.xlane.xlu0 %909  ;;  %v1067_v4 = vadd.f32 %v2218_v9, %v2214_v7 }
 0x33f   : > { %1611 = vpow2.f32 %v997_v1  ;;  %v951_v49 = vsub.f32 %v2120_v47, %v910_v10  ;;  %v952_v50 = vsub.f32 %v2122_v48, %v910_v10 }
 0x340   : > { %v2224_v5 = vpop.eup %1599  ;;  %1613 = vpow2.f32 %v999_v2  ;;  %1068 = vadd.xlane.f32.xlu1 %v1067_v4  ;;  %1071 = vadd.xlane.f32.xlu0 %v1070_v11 }
 0x341   : > { %v2228_v12 = vpop.eup %1601  ;;  %v993_v63 = vmul.f32 1.442695, %v951_v49  ;;  %v995_v61 = vmul.f32 1.442695, %v952_v50 }
 0x342   : > { %v907_v62 = vpop.xlane.xlu0 %906  ;;  %v1064_v0 = vadd.f32 %v2228_v12, %v2224_v5 }
 0x343   : > { %1615 = vpow2.f32 %v993_v63  ;;  %v949_v47 = vsub.f32 %v2116_v45, %v907_v62  ;;  %v950_v48 = vsub.f32 %v2118_v46, %v907_v62 }
 0x344   : > { %v2234_v13 = vpop.eup %1603  ;;  %1617 = vpow2.f32 %v995_v61  ;;  %1065 = vadd.xlane.f32.xlu0 %v1064_v0 }
 0x345   : > { %v2236_v14 = vpop.eup %1605  ;;  %v989_v15 = vmul.f32 1.442695, %v949_v47  ;;  %v991_v59 = vmul.f32 1.442695, %v950_v48 }
 0x346   : > { %v904_v60 = vpop.xlane.xlu0 %903  ;;  %v1061_v18 = vadd.f32 %v2236_v14, %v2234_v13 }
 0x347   : > { %1619 = vpow2.f32 %v989_v15  ;;  %v947_v57 = vsub.f32 %v2112_v43, %v904_v60  ;;  %v948_v58 = vsub.f32 %v2114_v44, %v904_v60  ;;  %v483_v60 = vld [vmem:[%s2458_s6] sm:$0xf] }
 0x348   : > { %v2242_v45 = vpop.eup %1607  ;;  %1621 = vpow2.f32 %v991_v59  ;;  %1062 = vadd.xlane.f32.xlu1 %v1061_v18 }
 0x349   : > { %v2244_v46 = vpop.eup %1609  ;;  %v985_v21 = vmul.f32 1.442695, %v947_v57  ;;  %v987_v22 = vmul.f32 1.442695, %v948_v58 }
 0x34a   : > { %v901_v56 = vpop.xlane.xlu0 %900  ;;  %v1058_v24 = vadd.f32 %v2244_v46, %v2242_v45 }
 0x34b   : > { %1623 = vpow2.f32 %v985_v21  ;;  %v945_v25 = vsub.f32 %v2108_v41, %v901_v56  ;;  %v946_v26 = vsub.f32 %v2110_v42, %v901_v56 }
 0x34c   : > { %v2250_v43 = vpop.eup %1611  ;;  %1625 = vpow2.f32 %v987_v22  ;;  %1059 = vadd.xlane.f32.xlu0 %v1058_v24 }
 0x34d   : > { %v2252_v44 = vpop.eup %1613  ;;  %v981_v27 = vmul.f32 1.442695, %v945_v25  ;;  %v983_v53 = vmul.f32 1.442695, %v946_v26 }
 0x34e   : > { %v898_v54 = vpop.xlane.xlu0 %897  ;;  %v1055_v29 = vadd.f32 %v2252_v44, %v2250_v43 }
 0x34f   : > { %1627 = vpow2.f32 %v981_v27  ;;  %v943_v31 = vsub.f32 %v2104_v39, %v898_v54  ;;  %v944_v32 = vsub.f32 %v2106_v40, %v898_v54 }
 0x350   : > { %v2258_v41 = vpop.eup %1615  ;;  %1629 = vpow2.f32 %v983_v53  ;;  %1056 = vadd.xlane.f32.xlu1 %v1055_v29 }
 0x351   : > { %v2260_v42 = vpop.eup %1617  ;;  %v977_v34 = vmul.f32 1.442695, %v943_v31  ;;  %v979_v51 = vmul.f32 1.442695, %v944_v32 }
 0x352   : > { %v895_v52 = vpop.xlane.xlu0 %894  ;;  %v1052_v8 = vadd.f32 %v2260_v42, %v2258_v41 }
 0x353   : > { %1631 = vpow2.f32 %v977_v34  ;;  %v941_v1 = vsub.f32 %v2100_v37, %v895_v52  ;;  %v942_v2 = vsub.f32 %v2102_v38, %v895_v52 }
 0x354   : > { %v2266_v39 = vpop.eup %1619  ;;  %1633 = vpow2.f32 %v979_v51  ;;  %1053 = vadd.xlane.f32.xlu0 %v1052_v8 }
 0x355   : > { %v2268_v40 = vpop.eup %1621  ;;  %v973_v10 = vmul.f32 1.442695, %v941_v1  ;;  %v975_v4 = vmul.f32 1.442695, %v942_v2 }
 0x356   : > { %v1049_v49 = vadd.f32 %v2268_v40, %v2266_v39 }
 0x357   : > { %1635 = vpow2.f32 %v973_v10 }
 0x358   : > { %v2272_v50 = vpop.eup %1623  ;;  %1637 = vpow2.f32 %v975_v4  ;;  %1050 = vadd.xlane.f32.xlu1 %v1049_v49 }
 0x359   : > { %v2274_v11 = vpop.eup %1625 }
 0x35a   : > { %v1046_v37 = vadd.f32 %v2274_v11, %v2272_v50 }
 0x35c   : > { %v2278_v38 = vpop.eup %1627  ;;  %1047 = vadd.xlane.f32.xlu0 %v1046_v37 }
 0x35d   : > { %v2280_v63 = vpop.eup %1629 }
 0x35e   : > { %v1043_v61 = vadd.f32 %v2280_v63, %v2278_v38 }
 0x360   : > { %v2284_v62 = vpop.eup %1631  ;;  %1044 = vadd.xlane.f32.xlu1 %v1043_v61 }
 0x361   : > { %v2286_v0 = vpop.eup %1633 }
 0x362   : > { %v1040_v47 = vadd.f32 %v2286_v0, %v2284_v62 }
 0x364   : > { %v2290_v48 = vpop.eup %1635  ;;  %1041 = vadd.xlane.f32.xlu0 %v1040_v47 }
 0x365   : > { %v2292_v15 = vpop.eup %1637 }
 0x366   : > { %v1037_v59 = vadd.f32 %v2292_v15, %v2290_v48 }
 0x368   : > { %1038 = vadd.xlane.f32.xlu1 %v1037_v59 }
 0x37a   : > { %486 = vperm.xlu0 %1573, %v483_v60  }
 0x3bd   : > { %v1084_v18 = vpop.xlane.xlu0 %1083 }
 0x3be   : > { %1639 = vrcp.f32 %v1084_v18 }
 0x3c1   : > { %v1075_v57 = vpop.xlane.xlu1 %1074  ;;  %v1081_v58 = vpop.xlane.xlu0 %1080 }
 0x3c2   : > { %1641 = vrcp.f32 %v1075_v57 }
 0x3c3   : > { %1643 = vrcp.f32 %v1081_v58 }
 0x3c5   : > { %v1078_v21 = vpop.xlane.xlu0 %1077 }
 0x3c6   : > { %1645 = vrcp.f32 %v1078_v21 }
 0x3c9   : > { %v1069_v22 = vpop.xlane.xlu1 %1068  ;;  %v1072_v56 = vpop.xlane.xlu0 %1071 }
 0x3ca   : > { %1647 = vrcp.f32 %v1069_v22 }
 0x3cb   : > { %1649 = vrcp.f32 %v1072_v56  ;;  %v1640_v24 = vpop.eup %1639 }
 0x3cc   : > { %v1132_v25 = vmul.f32 %v1640_v24, %v2188_v20  ;;  %v1131_v26 = vmul.f32 %v1640_v24, %v2186_v19 }
 0x3cd   : > { %v1066_v53 = vpop.xlane.xlu0 %1065 }
 0x3ce   : > { %1651 = vrcp.f32 %v1066_v53  ;;  %1133 = vmatprep.subr.mxu0 %v1132_v25  ;;  %1239 = vst [vmem:[%s2305_s22 + $0xf8] sm:$0xff] %v1132_v25  ;;  %1238 = vst [vmem:[%s2305_s22 + $0xf0] sm:$0xff] %v1131_v26 }
 0x3cf   : > { %v1642_v27 = vpop.eup %1641  ;;  %1134 = vmatpush1.xpose.msra.mxu0 %v1131_v26 }
 0x3d0   : > { %v1126_v54 = vmul.f32 %v1642_v27, %v2196_v23  ;;  %v1125_v20 = vmul.f32 %v1642_v27, %v2192_v55  ;;  %v1644_v29 = vpop.eup %1643 }
 0x3d1   : > { %v1063_v19 = vpop.xlane.xlu1 %1062  ;;  %v1130_v31 = vmul.f32 %v1644_v29, %v2184_v17  ;;  %v1129_v32 = vmul.f32 %v1644_v29, %v2182_v16 }
 0x3d2   : > { %1653 = vrcp.f32 %v1063_v19  ;;  %1233 = vst [vmem:[%s2305_s22 + $0xc8] sm:$0xff] %v1126_v54  ;;  %1232 = vst [vmem:[%s2305_s22 + $0xc0] sm:$0xff] %v1125_v20 }
 0x3d3   : > { %1135 = vmatprep.subr.mxu0 %v1130_v31  ;;  %1237 = vst [vmem:[%s2305_s22 + $0xe8] sm:$0xff] %v1130_v31  ;;  %1236 = vst [vmem:[%s2305_s22 + $0xe0] sm:$0xff] %v1129_v32  ;;  %v1646_v34 = vpop.eup %1645 }
 0x3d4   : > { %1136 = vmatpush1.xpose.msra.mxu0 %v1129_v32  ;;  %v1128_v55 = vmul.f32 %v1646_v34, %v2206_v30  ;;  %v1127_v51 = vmul.f32 %v1646_v34, %v2202_v28 }
 0x3d5   : > { %v1060_v23 = vpop.xlane.xlu0 %1059 }
 0x3d6   : > { %1655 = vrcp.f32 %v1060_v23  ;;  %1137 = vmatprep.subr.mxu0 %v1128_v55  ;;  %1235 = vst [vmem:[%s2305_s22 + $0xd8] sm:$0xff] %v1128_v55  ;;  %1234 = vst [vmem:[%s2305_s22 + $0xd0] sm:$0xff] %v1127_v51 }
 0x3d7   : > { %v1648_v17 = vpop.eup %1647 }
 0x3d8   : > { %v1122_v16 = vmul.f32 %v1648_v17, %v2218_v9  ;;  %v1121_v52 = vmul.f32 %v1648_v17, %v2214_v7  ;;  %v1650_v8 = vpop.eup %1649  ;;  %1138 = vmatpush1.xpose.msra.mxu0 %v1127_v51 }
 0x3d9   : > { %v1057_v1 = vpop.xlane.xlu1 %1056  ;;  %1139 = vmatprep.subr.mxu0 %v1126_v54  ;;  %v1124_v30 = vmul.f32 %v1650_v8, %v2210_v3  ;;  %v1123_v28 = vmul.f32 %v1650_v8, %v2208_v33 }
 0x3da   : > { %1657 = vrcp.f32 %v1057_v1  ;;  %1229 = vst [vmem:[%s2305_s22 + $0xa8] sm:$0xff] %v1122_v16  ;;  %1228 = vst [vmem:[%s2305_s22 + $0xa0] sm:$0xff] %v1121_v52 }
 0x3db   : > { %1231 = vst [vmem:[%s2305_s22 + $0xb8] sm:$0xff] %v1124_v30  ;;  %1230 = vst [vmem:[%s2305_s22 + $0xb0] sm:$0xff] %v1123_v28  ;;  %v1652_v2 = vpop.eup %1651 }
 0x3dc   : > { %1140 = vmatpush1.xpose.msra.mxu0 %v1125_v20  ;;  %v1120_v9 = vmul.f32 %v1652_v2, %v2228_v12  ;;  %v1119_v10 = vmul.f32 %v1652_v2, %v2224_v5 }
 0x3dd   : > { %v1054_v7 = vpop.xlane.xlu0 %1053  ;;  %1141 = vmatprep.subr.mxu0 %v1124_v30 }
 0x3de   : > { %1659 = vrcp.f32 %v1054_v7  ;;  %1227 = vst [vmem:[%s2305_s22 + $0x98] sm:$0xff] %v1120_v9  ;;  %1226 = vst [vmem:[%s2305_s22 + $0x90] sm:$0xff] %v1119_v10 }
 0x3df   : > { %v1654_v4 = vpop.eup %1653 }
 0x3e0   : > { %v1118_v33 = vmul.f32 %v1654_v4, %v2236_v14  ;;  %v1117_v3 = vmul.f32 %v1654_v4, %v2234_v13  ;;  %1142 = vmatpush1.xpose.msra.mxu0 %v1123_v28 }
 0x3e1   : > { %v1051_v49 = vpop.xlane.xlu1 %1050  ;;  %1143 = vmatprep.subr.mxu0 %v1122_v16 }
 0x3e2   : > { %1661 = vrcp.f32 %v1051_v49  ;;  %1225 = vst [vmem:[%s2305_s22 + $0x88] sm:$0xff] %v1118_v33  ;;  %1224 = vst [vmem:[%s2305_s22 + $0x80] sm:$0xff] %v1117_v3 }
 0x3e3   : > { %v1656_v37 = vpop.eup %1655 }
 0x3e4   : > { %v1116_v12 = vmul.f32 %v1656_v37, %v2244_v46  ;;  %v1115_v5 = vmul.f32 %v1656_v37, %v2242_v45  ;;  %1144 = vmatpush1.xpose.msra.mxu0 %v1121_v52 }
 0x3e5   : > { %v1048_v61 = vpop.xlane.xlu0 %1047  ;;  %1145 = vmatprep.subr.mxu0 %v1120_v9 }
 0x3e6   : > { %1663 = vrcp.f32 %v1048_v61  ;;  %1223 = vst [vmem:[%s2305_s22 + $0x78] sm:$0xff] %v1116_v12  ;;  %1222 = vst [vmem:[%s2305_s22 + $0x70] sm:$0xff] %v1115_v5 }
 0x3e7   : > { %v1658_v13 = vpop.eup %1657 }
 0x3e8   : > { %v1114_v14 = vmul.f32 %v1658_v13, %v2252_v44  ;;  %v1113_v47 = vmul.f32 %v1658_v13, %v2250_v43  ;;  %1146 = vmatpush1.xpose.msra.mxu0 %v1119_v10 }
 0x3e9   : > { %v1045_v59 = vpop.xlane.xlu1 %1044  ;;  %1147 = vmatprep.subr.mxu0 %v1118_v33 }
 0x3ea   : > { %1665 = vrcp.f32 %v1045_v59  ;;  %1221 = vst [vmem:[%s2305_s22 + $0x68] sm:$0xff] %v1114_v14  ;;  %1220 = vst [vmem:[%s2305_s22 + $0x60] sm:$0xff] %v1113_v47 }
 0x3eb   : > { %v1660_v45 = vpop.eup %1659 }
 0x3ec   : > { %v1112_v46 = vmul.f32 %v1660_v45, %v2260_v42  ;;  %v1111_v60 = vmul.f32 %v1660_v45, %v2258_v41  ;;  %1148 = vmatpush1.xpose.msra.mxu0 %v1117_v3 }
 0x3ed   : > { %v1042_v18 = vpop.xlane.xlu0 %1041  ;;  %1149 = vmatprep.subr.mxu0 %v1116_v12 }
 0x3ee   : > { %1667 = vrcp.f32 %v1042_v18  ;;  %1219 = vst [vmem:[%s2305_s22 + $0x58] sm:$0xff] %v1112_v46  ;;  %1218 = vst [vmem:[%s2305_s22 + $0x50] sm:$0xff] %v1111_v60 }
 0x3ef   : > { %v1662_v43 = vpop.eup %1661 }
 0x3f0   : > { %v1110_v44 = vmul.f32 %v1662_v43, %v2268_v40  ;;  %v1109_v57 = vmul.f32 %v1662_v43, %v2266_v39  ;;  %1150 = vmatpush1.xpose.msra.mxu0 %v1115_v5 }
 0x3f1   : > { %v1039_v58 = vpop.xlane.xlu1 %1038  ;;  %1151 = vmatprep.subr.mxu0 %v1114_v14 }
 0x3f2   : > { %1669 = vrcp.f32 %v1039_v58  ;;  %1217 = vst [vmem:[%s2305_s22 + $0x48] sm:$0xff] %v1110_v44  ;;  %1216 = vst [vmem:[%s2305_s22 + $0x40] sm:$0xff] %v1109_v57 }
 0x3f3   : > { %v1664_v41 = vpop.eup %1663 }
 0x3f4   : > { %v1108_v42 = vmul.f32 %v1664_v41, %v2274_v11  ;;  %v1107_v21 = vmul.f32 %v1664_v41, %v2272_v50  ;;  %1152 = vmatpush1.xpose.msra.mxu0 %v1113_v47 }
 0x3f5   : > { %v487_v22 = vpop.permute.xlu0 %486  ;;  %1153 = vmatprep.subr.mxu0 %v1112_v46 }
 0x3f6   : > { %v561_v40 = vadd.f32 %v2098_v36, %v487_v22  ;;  %1215 = vst [vmem:[%s2305_s22 + $0x38] sm:$0xff] %v1108_v42  ;;  %1214 = vst [vmem:[%s2305_s22 + $0x30] sm:$0xff] %v1107_v21 }
 0x3f7   : > { %v1666_v39 = vpop.eup %1665 }
 0x3f8   : > { %1197 = vmatprep.mubr.f32.mxu0 %v561_v40  ;;  %v1106_v56 = vmul.f32 %v1666_v39, %v2280_v63  ;;  %v1105_v24 = vmul.f32 %v1666_v39, %v2278_v38  ;;  %1154 = vmatpush1.xpose.msra.mxu0 %v1111_v60 }
 0x3f9   : > { %1155 = vmatprep.subr.mxu0 %v1110_v44 }
 0x3fa   : > { %1213 = vst [vmem:[%s2305_s22 + $0x28] sm:$0xff] %v1106_v56  ;;  %1212 = vst [vmem:[%s2305_s22 + $0x20] sm:$0xff] %v1105_v24 }
 0x3fb   : > { %v1668_v50 = vpop.eup %1667 }
 0x3fc   : > { %v1104_v11 = vmul.f32 %v1668_v50, %v2286_v0  ;;  %v1103_v36 = vmul.f32 %v1668_v50, %v2284_v62  ;;  %1156 = vmatpush1.xpose.msra.mxu0 %v1109_v57  ;;  %v559_v62 = vadd.f32 %v2096_v35, %v487_v22 }
 0x3fd   : > { %1157 = vmatprep.subr.mxu0 %v1108_v42 }
 0x3fe   : > { %1211 = vst [vmem:[%s2305_s22 + $0x18] sm:$0xff] %v1104_v11  ;;  %1210 = vst [vmem:[%s2305_s22 + $0x10] sm:$0xff] %v1103_v36 }
 0x3ff   : > { %v1670_v63 = vpop.eup %1669 }
 0x400   : > { %v1102_v38 = vmul.f32 %v1670_v63, %v2292_v15  ;;  %v1101_v25 = vmul.f32 %v1670_v63, %v2290_v48  ;;  %1158 = vmatpush1.xpose.msra.mxu0 %v1107_v21 }
 0x401   : > { %1159 = vmatprep.subr.mxu0 %v1106_v56 }
 0x402   : > { %1209 = vst [vmem:[%s2305_s22 + $0x8] sm:$0xff] %v1102_v38  ;;  %1208 = vst [vmem:[%s2305_s22] sm:$0xff] %v1101_v25  ;;  %s1729_s22 = scalar_lea.vmem %s1728_s10, 8192 }
 0x403   : > { %p1731_p7 = scmp.lt.s32.totalorder %s1729_s22, %s1723_s18 }
 0x404   : > { %1160 = vmatpush1.xpose.msra.mxu0 %v1105_v24 }
 0x405   : > { %1161 = vmatprep.subr.mxu0 %v1104_v11  ;;  %p1732_p9 = por %p1731_p7, %p1730_p1 }
 0x407   : > { %p1733_p11 = pnand %p1732_p9, %p1726_p0 }
 0x408   : > { %1162 = vmatpush1.xpose.msra.mxu0 %v1103_v36 }
 0x409   : > { %1163 = vmatprep.subr.mxu0 %v1102_v38 }
 0x40c   : > { %1164 = vmatpush1.xpose.msra.mxu0 %v1101_v25 }
 0x40f   : > { %1198 = vmatmul.mubr.f32.vlgmr.msra.gmra.mxu0 %v559_v62 }
 0x410   : > { %1736 = shalt.err (!%p1733_p11)
}
 0x411   : > { %s1737_s29 = scalar_lea.hbm %s2379_s1, 4096  ;;  %s1741_s0 = scalar_lea.hbm %s2461_s9, 16384 }
 0x412   : > { %p1738_p13 = scmp.ne.s32.totalorder %s2379_s1, %s1737_s29  ;;  %p1742_p6 = scmp.lt.s32.totalorder %s2379_s1, %s2461_s9 }
 0x413   : > { %p1743_p5 = scmp.lt.s32.totalorder %s1741_s0, %s1737_s29 }
 0x414   : > { %p1739_p2 = pnand %p1738_p13, %p2485_p10 }
 0x415   : > { %p1744_p3 = por %p1743_p5, %p1742_p6 }
 0x416   : > { %p1740_p4 = pneg %p1739_p2 }
 0x418   : > { %p1745_p8 = pnand %p1744_p3, %p1740_p4 }
 0x41a   : > { %1748 = shalt.err (!%p1745_p8)
}
 0x41b   : > { %s1861_s18 = smov 256   ;;  %s1862_s10 = smov 16  }
 0x41c   : > { %1480 = dma.vmem_to_hbm [thread:$0]  (%p2485_p10), %s2374_s27, 4096, %s2379_s1, %s1246_s3, %s1861_s18, %s1861_s18, %s1862_s10  }
 0x41d   : > { %s1203_s22 = sld [smem:[#allocation2]]  ;;  %s1420_s26 = sshll.u32 %s2300_s23, 2 }
 0x41e   : > { %s1454_s21 = sshll.u32 %s1841_s15, 1  ;;  %s372_s19 = scalar_lea.vmem [#allocation8], %s1420_s26 }
 0x41f   : > { %s1257_s29 = sadd.s32 %s1837_s14, %s1454_s21  ;;  %s1261_s28 = sshll.u32 %s372_s19, 4  ;;  %s1262_s28 = int_to_ptr.vmem [resolvable:$true] %s1261_s28 }
 0x420   : > { %s1455_s0 = sshll.u32 %s1257_s29, 6  ;;  %s1241_s27 = scalar_lea.sflag [#allocation5], %s2300_s23 }
 0x421   : > { %s1259_s5 = scalar_lea.hbm %s2460_s8, %s1455_s0  ;;  %s1749_s1 = scalar_lea.vmem %s1262_s28, 64 }
 0x422   : > { %p1750_p12 = scmp.ne.s32.totalorder %s1262_s28, %s1749_s1  ;;  %s1863_s14 = smov [#allocation8]  }
 0x423   : > { %v1204_v35 = vstv %s1203_s22  ;;  %s1753_s15 = sshll.u32 %s1863_s14, 4  ;;  %s1754_s15 = int_to_ptr.vmem [resolvable:$false] %s1753_s15 }
 0x424   : > { %p1751_p0 = pnand %p1750_p12, %p2485_p10  ;;  %s1755_s3 = scalar_lea.vmem %s1754_s15, 128 }
 0x425   : > { %p1756_p7 = scmp.lt.s32.totalorder %s1262_s28, %s1754_s15  ;;  %p1757_p9 = scmp.lt.s32.totalorder %s1755_s3, %s1749_s1 }
 0x426   : > { %p1752_p1 = pneg %p1751_p0 }
 0x427   : > { %p1758_p11 = por %p1757_p9, %p1756_p7 }
 0x429   : > { %p1759_p13 = pnand %p1758_p11, %p1752_p1 }
 0x4cf   : > { %v1199_v0 = vpop.f32.mrf.mxu0 }
 0x4d0   : > { %v1205_v48 = vmul.f32 %v1204_v35, %v1199_v0 }
 0x4d1   : > { %v1201_v15 = vpop.f32.mrf.mxu0 }
 0x4d2   : > { %v1206_v26 = vadd.f32 %v1205_v48, %v2047_v6 }
 0x4d4   : > { %1207 = vst [vmem:[%s372_s19] sm:$0xf] %v1206_v26 }
 0x4d5   : > { %1762 = shalt.err (!%p1759_p13)
}
 0x4d6   : > { %s1763_s18 = scalar_lea.hbm %s1259_s5, 64  ;;  %s1767_s23 = scalar_lea.hbm %s2460_s8, 256 }
 0x4d7   : > { %p1764_p2 = scmp.ne.s32.totalorder %s1259_s5, %s1763_s18  ;;  %p1768_p5 = scmp.lt.s32.totalorder %s1259_s5, %s2460_s8 }
 0x4d8   : > { %p1769_p3 = scmp.lt.s32.totalorder %s1767_s23, %s1763_s18 }
 0x4d9   : > { %p1765_p4 = pnand %p1764_p2, %p2485_p10 }
 0x4da   : > { %p1770_p8 = por %p1769_p3, %p1768_p5 }
 0x4db   : > { %p1766_p6 = pneg %p1765_p4 }
 0x4dd   : > { %p1771_p12 = pnand %p1770_p8, %p1766_p6 }
 0x4df   : > { %1774 = shalt.err (!%p1771_p12)
}
 0x4e0   : > { %1479 = dma.vmem_to_hbm [thread:$0]  (%p2485_p10), %s1262_s28, 64, %s1259_s5, %s1241_s27  }
 0x4e1 PF: > { %p1501_p0 = scmp.ge.s32.totalorder %s1853_s7, 2  ;;  %s1292_s26 = sand.u32 1, %s1825_s11  }
 0x4e2   : > { %p2486_p1 = scmp.ne.s32.totalorder %s2474_s25, 0  ;;  %s1293_s21 = scalar_lea.sflag [#allocation5], %s1292_s26 }
 0x4e4   : > { %p1491_p7 = pnand %p1501_p0, %p2486_p1 }
 0x4e6   : > { %p1492_p9 = pneg %p1491_p7 }
 0x4e8   : > { %1816 = dma.done.wait (%p1492_p9), %s1293_s21, 64  }
 0x4e9   : > { %1818 = vsyncadd (%p1492_p9), %s1293_s21, 4294967232  ;;  %s1302_s29 = scalar_lea.sflag [#allocation10], %s1292_s26 }
 0x4ea   : > { %1820 = dma.done.wait (%p1492_p9), %s1302_s29, 4096  }
 0x4eb   : > { %1822 = vsyncadd (%p1492_p9), %s1302_s29, 4294963200  ;;  %s29_s7 = sadd.s32 1, %s1853_s7   ;;  %s2487_s5 = sld [smem:[#allocation15_spill]] }
 0x4ec   : > { %p26_p11 = scmp.ge.s32.totalorder %s29_s7, 6   ;;  %s2488_s11 = smov %s1829_s12 }
 0x4ed   : > { %s2489_s12 = smov %s1833_s13  ;;  %s2490_s13 = smov %s1996_s30 }
 0x4ee   : > { %s2491_s14 = smov %s1845_s16  ;;  %s2492_s15 = smov %s1849_s17 }
 0x4ef   : > { %s2493_s16 = smov %s2496_s20  ;;  %28 = sbr.rel (!%p26_p11) target bundleno = 17 (0x11), region = 114 }
 0x4f1   : > { %s2494_s17 = smov %s2487_s5 }
 0x4f4   :  { %1307 = vsyncpa [#allocation4], 1 }
 0x4f5   :  { %1309 = vsyncpa [#allocation4 + $0x1], 1 }
 0x4f6   :  { %1310 = vsyncpa [#allocation7], 1 }
 0x4f7   :  { %1311 = vsyncpa [#allocation5], 1 }
 0x4f8   :  { %1313 = vsyncpa [#allocation5 + $0x1], 1 }
 0x4f9   :  { %1314 = vsyncpa [#allocation10], 1 }
 0x4fa   :  { %1316 = vsyncpa [#allocation10 + $0x1], 1 }

</bundles_post_ra>
